<compile_context>
chip_gen: v7x
topology: tpu7x:2x2x1
jax: 0.10.0
libtpu: 0.0.40
codegen_flags: <defaults>
</compile_context>

<pallas_src>
import math

import jax
import jax.numpy as jnp
from jax.experimental import pallas as pl
from jax.experimental.pallas import tpu as pltpu

CURVATURE_K = -1.0          # geoopt.Stereographic(k=-1.0) == Poincare ball
MIN_NORM = 1e-15
_LANES = 128


def _round_up(v: int, m: int) -> int:
    return ((v + m - 1) // m) * m


def _sublane_multiple(dtype) -> int:
    itemsize = jnp.dtype(dtype).itemsize
    if itemsize >= 4:
        return 8
    if itemsize == 2:
        return 16
    return 32


def _make_packed_kernel(seg_d: int):
    """Lane-dense kernel: each 128-lane row holds 128 // seg_d original rows.

    Per-segment sum-of-squares is computed with one MXU matmul against a
    block-diagonal ones matrix, which also broadcasts the sum back across
    each seg_d-lane segment, so the scale stays in full-width vregs and the
    store is an unmasked, lane-dense vst.
    """
    shift = seg_d.bit_length() - 1          # seg_d divides 128 -> power of two

    def kernel(x_ref, o_ref):
        x = x_ref[...].astype(jnp.float32)                       # (TB, 128)
        li = jax.lax.broadcasted_iota(jnp.int32, (_LANES, _LANES), 0) >> shift
        lj = jax.lax.broadcasted_iota(jnp.int32, (_LANES, _LANES), 1) >> shift
        seg_ones = jnp.where(li == lj, 1.0, 0.0).astype(jnp.float32)
        x2 = x * x
        # Per-segment sum of squares, broadcast across each segment. (MXU)
        s = jnp.dot(x2, seg_ones,
                    precision=jax.lax.Precision.HIGHEST,
                    preferred_element_type=jnp.float32)
        s = jnp.maximum(s, jnp.float32(MIN_NORM * MIN_NORM))     # clamp on ||u||^2
        inv = jax.lax.rsqrt(s)                                   # EUP
        norm = s * inv                                           # clamped ||u||
        # k = -1  ->  sqrt(-k) == 1, so tan_k(norm)/norm == tanh(norm)/norm
        scale = jnp.tanh(norm) * inv                             # EUP + VPU mul
        o_ref[...] = (scale * x).astype(o_ref.dtype)

    return kernel


def _rowwise_kernel(x_ref, o_ref):
    """Fallback: manifold axis maps directly to lanes (D >= 128 or 128 % D != 0)."""
    x = x_ref[...].astype(jnp.float32)
    s = jnp.sum(x * x, axis=-1, keepdims=True)                   # XLU lane reduce
    s = jnp.maximum(s, jnp.float32(MIN_NORM * MIN_NORM))
    inv = jax.lax.rsqrt(s)
    norm = s * inv
    scale = jnp.tanh(norm) * inv
    o_ref[...] = (scale * x).astype(o_ref.dtype)


def _pick_block_rows(rows: int, row_bytes: int, sublane: int, target_bytes: int) -> int:
    br = max(1, target_bytes // max(row_bytes, 1))
    br = min(br, rows)
    br = max(sublane, (br // sublane) * sublane)
    return br


def expmap0(x: jax.Array, *, target_tile_bytes: int = 4 * 1024 * 1024) -> jax.Array:
    """Pallas TPU Stereographic.expmap0 (k = -1.0) along the last axis of [B, D]."""
    assert x.ndim == 2, "expected [B, D]"
    B, D = x.shape
    sub = _sublane_multiple(x.dtype)
    itemsize = jnp.dtype(x.dtype).itemsize

    # Lane-dense packing: fold `pack` consecutive rows into one 128-lane row.
    use_packed = (D < _LANES) and (_LANES % D == 0)
    pack = (_LANES // D) if use_packed else 1
    lanes = _LANES if use_packed else D

    rows = pl.cdiv(B, pack)
    row_bytes = lanes * itemsize
    block_rows = _pick_block_rows(rows, row_bytes, sub, target_tile_bytes)
    # Prefer >= 2 grid steps so the parallel axis can be sharded across both
    # v7x TensorCores (negligible overhead, helps bandwidth-bound streaming).
    if pl.cdiv(rows, block_rows) == 1 and rows > sub:
        block_rows = _round_up(pl.cdiv(rows, 2), sub)

    rows_padded = _round_up(rows, block_rows)
    b_padded = rows_padded * pack

    x_in = x if b_padded == B else jnp.pad(x, ((0, b_padded - B), (0, 0)))
    x2d = x_in.reshape(rows_padded, lanes)          # free, row-major reshape

    grid = (rows_padded // block_rows,)
    kernel = _make_packed_kernel(D) if use_packed else _rowwise_kernel

    # Double-buffered input + output tiles; only raise the scoped-VMEM limit
    # when the pipeline actually needs more than the conservative defaults.
    buf_bytes = 4 * block_rows * row_bytes
    vmem_limit = None
    if buf_bytes > 12 * 1024 * 1024:
        vmem_limit = min(64 * 1024 * 1024, _round_up(2 * buf_bytes, 1 << 20))

    out2d = pl.pallas_call(
        kernel,
        out_shape=jax.ShapeDtypeStruct((rows_padded, lanes), x.dtype),
        grid_spec=pltpu.PrefetchScalarGridSpec(
            num_scalar_prefetch=0,
            grid=grid,
            in_specs=[pl.BlockSpec((block_rows, lanes), lambda i: (i, 0))],
            out_specs=pl.BlockSpec((block_rows, lanes), lambda i: (i, 0)),
        ),
        compiler_params=pltpu.CompilerParams(
            dimension_semantics=("parallel",),
            vmem_limit_bytes=vmem_limit,
        ),
    )(x2d)

    out = out2d.reshape(b_padded, D)
    return out if b_padded == B else out[:B]


def expmap0_ref(x: jax.Array) -> jax.Array:
    """Pure-JAX reference (geoopt semantics) for verification."""
    x32 = x.astype(jnp.float32)
    norm = jnp.maximum(jnp.linalg.norm(x32, axis=-1, keepdims=True), MIN_NORM)
    sk = jnp.float32(math.sqrt(-CURVATURE_K))
    return (jnp.tanh(sk * norm) / (sk * norm) * x32).astype(x.dtype)


if __name__ == "__main__":
    key = jax.random.PRNGKey(0)
    B, D = 64, 32                      # latent batch, hidden=32 (manifold dim)
    x = jax.random.normal(key, (B, D), dtype=jnp.float32)

    out = jax.block_until_ready(expmap0(x))
    ref = expmap0_ref(x)
    assert out.shape == x.shape and out.dtype == x.dtype
    assert jnp.allclose(out, ref, atol=1e-5, rtol=1e-5), "mismatch vs reference"

    # Extra coverage: padded batch (not divisible) and fallback layout (128 % D != 0).
    for i, shape in enumerate([(67, 32), (16, 48)]):
        xt = jax.random.normal(jax.random.PRNGKey(i + 1), shape, dtype=jnp.float32)
        ot = jax.block_until_ready(expmap0(xt))
        assert jnp.allclose(ot, expmap0_ref(xt), atol=1e-5, rtol=1e-5), f"mismatch {shape}"

    print("KERNEL_OK")
</pallas_src>

<mosaic_0001>
module attributes {stable_mosaic.version = 11 : i64} {
  func.func @kernel(%arg0: i32, %arg1: memref<8x128xf32, #tpu.memory_space<vmem>>, %arg2: memref<8x128xf32, #tpu.memory_space<vmem>>) attributes {dimension_semantics = [#tpu.dimension_semantics<parallel>], iteration_bounds = array<i64: 2>, scalar_prefetch = 0 : i64, scratch_operands = 0 : i64, tpu.core_type = #tpu.core_type<tc>, window_params = [{transform_indices = @transform_0, window_bounds = array<i64: 8, 128>}, {transform_indices = @transform_1, window_bounds = array<i64: 8, 128>}]} {
    %c0 = arith.constant 0 : index
    %c0_0 = arith.constant 0 : index
    %0 = vector.load %arg1[%c0, %c0_0] : memref<8x128xf32, #tpu.memory_space<vmem>>, vector<8x128xf32>
    %1 = tpu.iota {dimensions = array<i32: 0>} : vector<128x128xi32>
    %c5_i32 = arith.constant 5 : i32
    %2 = vector.broadcast %c5_i32 : i32 to vector<128x128xi32>
    %3 = arith.shrsi %1, %2 : vector<128x128xi32>
    %4 = tpu.iota {dimensions = array<i32: 1>} : vector<128x128xi32>
    %c5_i32_1 = arith.constant 5 : i32
    %5 = vector.broadcast %c5_i32_1 : i32 to vector<128x128xi32>
    %6 = arith.shrsi %4, %5 : vector<128x128xi32>
    %7 = arith.cmpi eq, %3, %6 : vector<128x128xi32>
    %cst = arith.constant 1.000000e+00 : f32
    %cst_2 = arith.constant 0.000000e+00 : f32
    %8 = vector.broadcast %cst : f32 to vector<128x128xf32>
    %9 = vector.broadcast %cst_2 : f32 to vector<128x128xf32>
    %10 = arith.select %7, %8, %9 : vector<128x128xi1>, vector<128x128xf32>
    %11 = arith.mulf %0, %0 : vector<8x128xf32>
    %cst_3 = arith.constant dense<0.000000e+00> : vector<8x128xf32>
    %12 = tpu.matmul %11, %10, %cst_3 {dimension_numbers = #tpu.dot_dimension_numbers<[1], [0], [0], [1], [0, 0, 1, 1], [], []>, precision = #tpu.contract_precision<fp32>} : vector<8x128xf32>, vector<128x128xf32>, vector<8x128xf32> -> vector<8x128xf32>
    %cst_4 = arith.constant 1.000000e-30 : f32
    %13 = vector.broadcast %cst_4 : f32 to vector<8x128xf32>
    %14 = arith.maximumf %12, %13 : vector<8x128xf32>
    %15 = math.rsqrt %14 : vector<8x128xf32>
    %16 = arith.mulf %14, %15 : vector<8x128xf32>
    %17 = math.tanh %16 : vector<8x128xf32>
    %18 = arith.mulf %17, %15 : vector<8x128xf32>
    %19 = arith.mulf %18, %0 : vector<8x128xf32>
    %c0_5 = arith.constant 0 : index
    %c0_6 = arith.constant 0 : index
    %20 = vector.load %arg2[%c0_5, %c0_6] : memref<8x128xf32, #tpu.memory_space<vmem>>, vector<8x128xf32>
    tpu.vector_store %arg2[%c0_5, %c0_6], %19 {strides = array<i32>} : memref<8x128xf32, #tpu.memory_space<vmem>>, vector<8x128xf32>,
    return
  }
  func.func @transform_0(%arg0: i32) -> (i32, i32) {
    %c0_i32 = arith.constant 0 : i32
    %c0_i32_0 = arith.constant 0 : i32
    return %arg0, %c0_i32 : i32, i32
  }
  func.func @transform_1(%arg0: i32) -> (i32, i32) {
    %c0_i32 = arith.constant 0 : i32
    %c0_i32_0 = arith.constant 0 : i32
    return %arg0, %c0_i32 : i32, i32
  }
}

</mosaic_0001>

<bundles_post_ra>
// kernel: tpu_custom_call.1
= control target key start
LH: loop header
LB: loop body
LE: loop exit
PB: predicated region body
PF: predicated region fallthrough
CT: control target
= control target key end

     0   :  { %6 = vsyncpa [#allocation3], 0  ;;  %s2143_s0 = inlined_call_operand.hbm [shape: f32[16,128], index: 0, kind: input, shape index: {}]   ;;  %s2144_s1 = inlined_call_operand.hbm [shape: f32[16,128], index: 1, kind: output, shape index: {}]  }
   0x1   :  { %8 = vsyncpa [#allocation3 + $0x1], 0 }
   0x2   :  { %9 = vsyncpa [#allocation4], 0 }
   0x3   :  { %11 = vsyncpa [#allocation4 + $0x1], 0  ;;  %s1531_s6 = smov 0   ;;  %s1533_s7 = smov 0  }
   0x4   :  { %s1535_s8 = smov 0   ;;  %s1537_s9 = smov 0  }
   0x5 LB: > { %s1552_s10 = sadd.s32 4294967295, %s1513_s9   ;;  %s838_s11 = sadd.s32 4294967294, %s1513_s9   ;;  %s1513_s9 = sphi %s1537_s9, %s2207_s9   ;;  %s1509_s8 = sphi %s1535_s8, %s2206_s8   ;;  %s1505_s7 = sphi %s1533_s7, %s2205_s7   ;;  %s1501_s6 = sphi %s1531_s6, %s2204_s6  }
   0x6   : > { %s1556_s12 = sadd.s32 1, %s1513_s9   ;;  %s24_s13 = sadd.s32 1, %s1509_s8 }
   0x7   : > { %s21_s14 = ssub.s32 %s1513_s9, %s1556_s12  ;;  %p31_p0 = scmp.ne.s32.totalorder %s1509_s8, %s1505_s7 }
   0x8   : > { %p22_p1 = scmp.eq.s32.totalorder %s21_s14, 0  ;;  %p32_p2 = scmp.eq.s32.totalorder %s1513_s9, 0 }
   0x9   : > { %p37_p3 = scmp.ne.s32.totalorder %s1505_s7, %s1501_s6  ;;  %p38_p4 = scmp.eq.s32.totalorder %s1552_s10, 0 }
   0xa   : > { %s1568_s15 = scalar_select %p22_p1, %s1509_s8, %s24_s13  }
   0xb   : > { %p1570_p5 = por %p32_p2, %p31_p0  ;;  %p1574_p6 = por %p38_p4, %p37_p3 }
   0xc   : > { %p61_p7 = scmp.eq.s32.totalorder %s1552_s10, 1  ;;  %p67_p8 = scmp.eq.s32.totalorder %s838_s11, 1 }
   0xd   : > { %p1375_p10 = scmp.lt.s32.totalorder %s1513_s9, 2  ;;  %s87_s20 = sand.u32 1, %s1509_s8  }
   0xe   : > { %p1581_p11 = por %p61_p7, %p31_p0  ;;  %p1585_p12 = por %p67_p8, %p37_p3 }
   0xf   : > { %s842_s21 = sshll.u32 %s1513_s9, 7  ;;  %s841_s22 = sshll.u32 %s87_s20, 3 }
  0x10   : > { %s2148_s18 = scalar_select %p1581_p11, 1, 0 }
  0x11   : > { %s2149_s19 = scalar_select %p1585_p12, 1, 0 }
  0x12   : > { %s1594_s25 = scalar_lea.hbm %s2143_s0, %s842_s21  ;;  %s91_s26 = scalar_lea.vmem [#allocation2], %s841_s22 }
  0x13   : > { %s98_s27 = sshll.u32 %s91_s26, 4  ;;  %p1598_p13 = pnand %p1375_p10, %p1570_p5  ;;  %s1602_s27 = int_to_ptr.vmem [resolvable:$true] %s98_s27 }
  0x14   : > { %s88_s29 = scalar_lea.sflag [#allocation3], %s87_s20  ;;  %s1417_s30 = scalar_lea.hbm %s1594_s25, 128 }
  0x15   : > { %p1418_p2 = scmp.ne.s32.totalorder %s1594_s25, %s1417_s30  ;;  %p1419_p3 = pneg %p1598_p13 }
  0x16   : > { %s1422_s4 = scalar_lea.hbm %s2143_s0, 256  ;;  %p1423_p5 = scmp.lt.u32.totalorder %s1594_s25, %s2143_s0 }
  0x17   : > { %p1420_p4 = pnand %p1419_p3, %p1418_p2  ;;  %p1424_p8 = scmp.lt.u32.totalorder %s1422_s4, %s1417_s30 }
  0x18   : > { %p1426_p9 = scmp.lt.u32.totalorder %s1417_s30, %s1594_s25 }
  0x19   : > { %p1421_p7 = pneg %p1420_p4  ;;  %p1425_p10 = por %p1424_p8, %p1423_p5 }
  0x1b   : > { %p1427_p0 = por %p1426_p9, %p1425_p10 }
  0x1d   : > { %p1428_p1 = pnand %p1427_p0, %p1421_p7 }
  0x1f   : > { %1431 = shalt.err (!%p1428_p1)
}
  0x20   : > { %s1432_s13 = scalar_lea.vmem %s1602_s27, 128  ;;  %s1515_s14 = smov [#allocation2]  }
  0x21   : > { %p1433_p2 = scmp.ne.s32.totalorder %s1602_s27, %s1432_s13  ;;  %s1437_s16 = sshll.u32 %s1515_s14, 4  ;;  %s1438_s16 = int_to_ptr.vmem [resolvable:$false] %s1437_s16 }
  0x22   : > { %s1439_s20 = scalar_lea.vmem %s1438_s16, 256  ;;  %p1440_p11 = scmp.lt.s32.totalorder %s1602_s27, %s1438_s16 }
  0x23   : > { %p1435_p4 = pnand %p1433_p2, %p1419_p3  ;;  %p1441_p5 = scmp.lt.s32.totalorder %s1439_s20, %s1432_s13 }
  0x25   : > { %p1436_p12 = pneg %p1435_p4  ;;  %p1442_p8 = por %p1441_p5, %p1440_p11 }
  0x27   : > { %p1443_p9 = pnand %p1442_p8, %p1436_p12 }
  0x29   : > { %1446 = shalt.err (!%p1443_p9)
}
  0x2a   : > { %1370 = dma.hbm_to_vmem [thread:$0]  (!%p1598_p13), %s1594_s25, 128, %s1602_s27, %s88_s29  }
  0x2b   : > { %p2151_p0 = scmp.lt.s32.totalorder %s1513_s9, 3  ;;  %p2152_p1 = scmp.ge.s32.totalorder %s1513_s9, 1 }
  0x2d   : > { %p104_p3 = pnand %p2152_p1, %p2151_p0 }
  0x2e   : > { %s1636_s21 = sand.u32 (!%p104_p3), 1, %s1505_s7   ;;  %v133_v0 = vlaneseq (!%p104_p3) }
  0x2f   : > { %107 = sbr.rel (%p104_p3) target bundleno = 416 (0x1a0), region = 24  ;;  %s844_s22 = sshll.u32 (!%p104_p3), %s1636_s21, 3 }
  0x30   : > { %s110_s23 = scalar_lea.sflag (!%p104_p3), [#allocation3], %s1636_s21  ;;  %s1642_s24 = scalar_lea.vmem (!%p104_p3), [#allocation2], %s844_s22 }
  0x36   : > { %1492 = dma.done.wait (%p1574_p6), %s110_s23, 128  }
  0x37   : > { %1494 = vsyncadd (%p1574_p6), %s110_s23, 4294967168  ;;  %v1516_v1 = vmov 0.0|0.0   ;;  %v1650_v2 = vshrl.u32 %v133_v0, 7  ;;  %v167_v3 = vand.u32 127, %v133_v0  ;;  %vm1517_vm0 = vmmov 0   ;;  %v1813_v56 = vld [vmem:[%s1642_s24] sm:$0xff] }
  0x38   : > { %1210 = vmatprep.subr.bf16.mxu1 %v1516_v1  ;;  %1282 = vmatprep.subr.bf16.mxu0 %v1516_v1  ;;  %v1518_v4 = vmov 0.0   ;;  %v1519_v24 = vmov 1.0|1.0   ;;  %s895_s17 = sshll.u32 %s1552_s10, 7  ;;  %s131_s25 = scalar_lea.vmem [#allocation5], %s844_s22 }
  0x39   : > { %1032 = vmatprep.mubr.msk.f32.mxu1 %vm1517_vm0, %v1518_v4  ;;  %1137 = vmatprep.mubr.msk.f32.mxu0 %vm1517_vm0, %v1518_v4  ;;  %v135_v5 = vadd.s32 8, %v1650_v2  ;;  %v150_v6 = vshra.s32 %v1650_v2, 5  ;;  %v1658_v7 = vshra.s32 %v167_v3, 5  ;;  %v136_v8 = vadd.s32 16, %v1650_v2  ;;  %s768_s26 = sshll.u32 %s131_s25, 4  ;;  %s2099_s29 = scalar_lea.hbm %s2144_s1, %s895_s17  ;;  %s2101_s26 = int_to_ptr.vmem [resolvable:$true] %s768_s26 }
  0x3a   : > { %v137_v9 = vadd.s32 24, %v1650_v2  ;;  %v138_v10 = vadd.s32 32, %v1650_v2  ;;  %v139_v11 = vadd.s32 40, %v1650_v2  ;;  %v140_v16 = vadd.s32 48, %v1650_v2  ;;  %s755_s30 = scalar_lea.sflag [#allocation4], %s1636_s21  ;;  %s1447_s2 = scalar_lea.vmem %s2101_s26, 128 }
  0x3b   : > { %v151_v12 = vshra.s32 %v135_v5, 5  ;;  %vm1665_vm1 = vcmp.eq.s32.totalorder %v150_v6, %v1658_v7  ;;  %v152_v14 = vshra.s32 %v136_v8, 5  ;;  %v141_v17 = vadd.s32 56, %v1650_v2  ;;  %p1448_p6 = scmp.ne.s32.totalorder %s2101_s26, %s1447_s2  ;;  %p2201_p11 = scmp.ne.s32.totalorder %s2148_s18, 0 }
  0x3c   : > { %v153_v15 = vshra.s32 %v137_v9, 5  ;;  %v154_v20 = vshra.s32 %v138_v10, 5  ;;  %v155_v21 = vshra.s32 %v139_v11, 5  ;;  %v156_v28 = vshra.s32 %v140_v16, 5  ;;  %s1520_s10 = smov [#allocation5]  }
  0x3d   : > { %vm1672_vm2 = vcmp.eq.s32.totalorder %v151_v12, %v1658_v7  ;;  %vm1677_vm3 = vcmp.eq.s32.totalorder %v152_v14, %v1658_v7  ;;  %v157_v29 = vshra.s32 %v141_v17, 5  ;;  %v185_v30 = vsel %vm1665_vm1, 1.0, %v1518_v4  ;;  %p1449_p12 = pnand %p1448_p6, %p2201_p11  ;;  %s1451_s3 = sshll.u32 %s1520_s10, 4  ;;  %s1452_s3 = int_to_ptr.vmem [resolvable:$false] %s1451_s3 }
  0x3e   : > { %vm1685_vm4 = vmpackc.low %vm1672_vm2, %vm1665_vm1  ;;  %vm1690_vm5 = vcmp.eq.s32.totalorder %v153_v15, %v1658_v7  ;;  %vm1711_vm7 = vcmp.eq.s32.totalorder %v154_v20, %v1658_v7  ;;  %vm1716_vm8 = vcmp.eq.s32.totalorder %v155_v21, %v1658_v7  ;;  %vm1740_vm10 = vcmp.eq.s32.totalorder %v156_v28, %v1658_v7  ;;  %s1453_s4 = scalar_lea.vmem %s1452_s3, 256  ;;  %p1454_p7 = scmp.lt.s32.totalorder %s2101_s26, %s1452_s3 }
  0x3f   : > { %1212 = vmatpush3.bf16.msk.msra.mxu1 %vm1685_vm4, %v1519_v24  ;;  %1284 = vmatpush3.bf16.msk.msra.mxu0 %vm1685_vm4, %v1519_v24  ;;  %vm1706_vm6 = vmpackc.low %vm1690_vm5, %vm1677_vm3  ;;  %vm1745_vm11 = vcmp.eq.s32.totalorder %v157_v29, %v1658_v7  ;;  %v142_v34 = vadd.s32 64, %v1650_v2  ;;  %v143_v35 = vadd.s32 72, %v1650_v2  ;;  %v144_v36 = vadd.s32 80, %v1650_v2  ;;  %p1450_p13 = pneg %p1449_p12  ;;  %p1455_p10 = scmp.lt.s32.totalorder %s1453_s4, %s1447_s2 }
  0x40   : > { %1213 = vmatprep.subr.bf16.mxu1 %v1516_v1  ;;  %1285 = vmatprep.subr.bf16.mxu0 %v1516_v1  ;;  %vm1735_vm9 = vmpackc.low %vm1716_vm8, %vm1711_vm7  ;;  %v145_v37 = vadd.s32 88, %v1650_v2  ;;  %v186_v38 = vsel %vm1672_vm2, 1.0, %v1518_v4  ;;  %v1762_v41 = vsub.f32 %v185_v30, %v185_v30  ;;  %v146_v43 = vadd.s32 96, %v1650_v2 }
  0x41   : > { %v158_v39 = vshra.s32 %v142_v34, 5  ;;  %v159_v40 = vshra.s32 %v143_v35, 5  ;;  %vm1770_vm12 = vmpackc.low %vm1745_vm11, %vm1740_vm10  ;;  %v147_v44 = vadd.s32 104, %v1650_v2  ;;  %v160_v47 = vshra.s32 %v144_v36, 5  ;;  %p1456_p2 = por %p1455_p10, %p1454_p7 }
  0x42   : > { %v161_v48 = vshra.s32 %v145_v37, 5  ;;  %v1786_v49 = vsub.f32 %v186_v38, %v186_v38  ;;  %v187_v50 = vsel %vm1677_vm3, 1.0, %v1518_v4  ;;  %v279_v51 = vand.u32 4294901760, %v1762_v41 }
  0x43   : > { %1215 = vmatpush3.bf16.msk.msra.mxu1 %vm1706_vm6, %v1519_v24  ;;  %1287 = vmatpush3.bf16.msk.msra.mxu0 %vm1706_vm6, %v1519_v24  ;;  %vm1777_vm13 = vcmp.eq.s32.totalorder %v158_v39, %v1658_v7  ;;  %vm1782_vm14 = vcmp.eq.s32.totalorder %v159_v40, %v1658_v7  ;;  %v188_v52 = vsel %vm1690_vm5, 1.0, %v1518_v4  ;;  %v162_v54 = vshra.s32 %v146_v43, 5  ;;  %p1457_p4 = pnand %p1456_p2, %p1450_p13 }
  0x44   : > { %1216 = vmatprep.subr.bf16.mxu1 %v1516_v1  ;;  %1288 = vmatprep.subr.bf16.mxu0 %v1516_v1  ;;  %vm1807_vm15 = vmpackc.low %vm1782_vm14, %vm1777_vm13  ;;  %v148_v55 = vadd.s32 112, %v1650_v2  ;;  %vm1816_vm1 = vcmp.eq.s32.totalorder %v160_v47, %v1658_v7  ;;  %vm1821_vm2 = vcmp.eq.s32.totalorder %v161_v48, %v1658_v7  ;;  %v163_v59 = vshra.s32 %v147_v44, 5 }
  0x45   : > { %v149_v60 = vadd.s32 120, %v1650_v2  ;;  %v285_v61 = vand.u32 4294901760, %v1786_v49  ;;  %v1827_v62 = vsub.f32 %v187_v50, %v187_v50  ;;  %v1829_v63 = vsub.f32 %v188_v52, %v188_v52  ;;  %vm1857_vm3 = vmpackc.low %vm1821_vm2, %vm1816_vm1 }
  0x46   : > { %v189_v0 = vsel %vm1711_vm7, 1.0, %v1518_v4  ;;  %v201_v2 = vmul.f32 %v1813_v56, %v1813_v56  ;;  %v280_v3 = vsub.f32 %v1762_v41, %v279_v51  ;;  %v190_v5 = vsel %vm1716_vm8, 1.0, %v1518_v4 }
  0x47   : > { %1218 = vmatpush3.bf16.msk.msra.mxu1 %vm1735_vm9, %v1519_v24  ;;  %1290 = vmatpush3.bf16.msk.msra.mxu0 %vm1735_vm9, %v1519_v24  ;;  %v191_v6 = vsel %vm1740_vm10, 1.0, %v1518_v4  ;;  %vm1862_vm5 = vcmp.eq.s32.totalorder %v162_v54, %v1658_v7  ;;  %vm1867_vm7 = vcmp.eq.s32.totalorder %v163_v59, %v1658_v7  ;;  %v164_v11 = vshra.s32 %v148_v55, 5 }
  0x48   : > { %1219 = vmatprep.subr.bf16.mxu1 %v1516_v1  ;;  %1291 = vmatprep.subr.bf16.mxu0 %v1516_v1  ;;  %v165_v12 = vshra.s32 %v149_v60, 5  ;;  %v1871_v13 = vand.u32 4294901760, %v201_v2  ;;  %v286_v14 = vsub.f32 %v1786_v49, %v285_v61  ;;  %v1874_v15 = vsub.f32 %v189_v0, %v189_v0  ;;  %vm1900_vm8 = vmpackc.low %vm1867_vm7, %vm1862_vm5 }
  0x49   : > { %v192_v16 = vsel %vm1745_vm11, 1.0, %v1518_v4  ;;  %v291_v17 = vand.u32 4294901760, %v1827_v62  ;;  %v297_v18 = vand.u32 4294901760, %v1829_v63  ;;  %v1881_v19 = vsub.f32 %v190_v5, %v190_v5 }
  0x4a   : > { %v1890_v20 = vsub.f32 %v201_v2, %v1871_v13  ;;  %v281_v21 = vand.u32 4294901760, %v280_v3  ;;  %v1892_v23 = vsub.f32 %v191_v6, %v191_v6  ;;  %v1904_v27 = vsub.f32 %v192_v16, %v192_v16 }
  0x4b   : > { %1221 = vmatpush3.bf16.msk.msra.mxu1 %vm1770_vm12, %v1519_v24  ;;  %1293 = vmatpush3.bf16.msk.msra.mxu0 %vm1770_vm12, %v1519_v24  ;;  %vm1907_vm10 = vcmp.eq.s32.totalorder %v164_v11, %v1658_v7  ;;  %vm1912_vm11 = vcmp.eq.s32.totalorder %v165_v12, %v1658_v7  ;;  %v287_v32 = vand.u32 4294901760, %v286_v14  ;;  %v303_v33 = vand.u32 4294901760, %v1874_v15 }
  0x4c   : > { %1222 = vmatprep.subr.bf16.mxu1 %v1516_v1  ;;  %1294 = vmatprep.subr.bf16.mxu0 %v1516_v1  ;;  %v269_v30 = vand.u32 4294901760, %v1890_v20  ;;  %v193_v34 = vsel %vm1777_vm13, 1.0, %v1518_v4  ;;  %v194_v35 = vsel %vm1782_vm14, 1.0, %v1518_v4  ;;  %v309_v36 = vand.u32 4294901760, %v1881_v19  ;;  %vm1941_vm13 = vmpackc.low %vm1912_vm11, %vm1907_vm10 }
  0x4d   : > { %v292_v37 = vsub.f32 %v1827_v62, %v291_v17  ;;  %v298_v38 = vsub.f32 %v1829_v63, %v297_v18  ;;  %v315_v39 = vand.u32 4294901760, %v1892_v23  ;;  %v321_v43 = vand.u32 4294901760, %v1904_v27 }
  0x4e   : > { %v270_v7 = vsub.f32 %v1890_v20, %v269_v30  ;;  %v1946_v44 = vsub.f32 %v193_v34, %v193_v34  ;;  %v1948_v45 = vsub.f32 %v194_v35, %v194_v35  ;;  %v195_v46 = vsel %vm1816_vm1, 1.0, %v1518_v4 }
  0x4f   : > { %1224 = vmatpush3.bf16.msk.msra.mxu1 %vm1807_vm15, %v1519_v24  ;;  %1296 = vmatpush3.bf16.msk.msra.mxu0 %vm1807_vm15, %v1519_v24  ;;  %v196_v47 = vsel %vm1821_vm2, 1.0, %v1518_v4  ;;  %v1235_v50 = vpack.c.bf16 %v287_v32, %v281_v21  ;;  %v1307_v52 = vpack.c.bf16 %v285_v61, %v279_v51  ;;  %v293_v54 = vand.u32 4294901760, %v292_v37 }
  0x50   : > { %1225 = vmatprep.subr.bf16.mxu1 %v1516_v1  ;;  %1297 = vmatprep.subr.bf16.mxu0 %v1516_v1  ;;  %v271_v48 = vand.u32 4294901760, %v270_v7  ;;  %v299_v55 = vand.u32 4294901760, %v298_v38  ;;  %v304_v57 = vsub.f32 %v1874_v15, %v303_v33  ;;  %v310_v58 = vsub.f32 %v1881_v19, %v309_v36 }
  0x51   : > { %v327_v51 = vand.u32 4294901760, %v1946_v44  ;;  %v333_v59 = vand.u32 4294901760, %v1948_v45  ;;  %v1970_v60 = vsub.f32 %v195_v46, %v195_v46  ;;  %v1972_v61 = vsub.f32 %v196_v47, %v196_v47 }
  0x52   : > { %v197_v0 = vsel %vm1862_vm5, 1.0, %v1518_v4  ;;  %v198_v2 = vsel %vm1867_vm7, 1.0, %v1518_v4  ;;  %v1310_v3 = vpack.c.bf16 %v297_v18, %v291_v17  ;;  %v316_v5 = vsub.f32 %v1892_v23, %v315_v39 }
  0x53   : > { %1227 = vmatpush3.bf16.msk.msra.mxu1 %vm1857_vm3, %v1519_v24  ;;  %1299 = vmatpush3.bf16.msk.msra.mxu0 %vm1857_vm3, %v1519_v24  ;;  %v1238_v6 = vpack.c.bf16 %v299_v55, %v293_v54  ;;  %v305_v11 = vand.u32 4294901760, %v304_v57  ;;  %v311_v12 = vand.u32 4294901760, %v310_v58  ;;  %v322_v14 = vsub.f32 %v1904_v27, %v321_v43 }
  0x54   : > { %1228 = vmatprep.subr.bf16.mxu1 %v1516_v1  ;;  %1300 = vmatprep.subr.bf16.mxu0 %v1516_v1  ;;  %v339_v9 = vand.u32 4294901760, %v1970_v60  ;;  %v345_v10 = vand.u32 4294901760, %v1972_v61  ;;  %v1986_v16 = vsub.f32 %v197_v0, %v197_v0  ;;  %v1988_v17 = vsub.f32 %v198_v2, %v198_v2 }
  0x55   : > { %v199_v18 = vsel %vm1907_vm10, 1.0, %v1518_v4  ;;  %v200_v21 = vsel %vm1912_vm11, 1.0, %v1518_v4  ;;  %v317_v32 = vand.u32 4294901760, %v316_v5  ;;  %v1241_v34 = vpack.c.bf16 %v311_v12, %v305_v11 }
  0x56   : > { %v323_v35 = vand.u32 4294901760, %v322_v14  ;;  %v328_v7 = vsub.f32 %v1946_v44, %v327_v51  ;;  %v334_v37 = vsub.f32 %v1948_v45, %v333_v59  ;;  %v351_v28 = vand.u32 4294901760, %v1986_v16 }
  0x57   : > { %1230 = vmatpush3.bf16.msk.msra.mxu1 %vm1900_vm8, %v1519_v24  ;;  %1302 = vmatpush3.bf16.msk.msra.mxu0 %vm1900_vm8, %v1519_v24  ;;  %v357_v38 = vand.u32 4294901760, %v1988_v17  ;;  %v2006_v29 = vsub.f32 %v199_v18, %v199_v18  ;;  %v340_v46 = vsub.f32 %v1970_v60, %v339_v9  ;;  %v1319_v57 = vpack.c.bf16 %v333_v59, %v327_v51 }
  0x58   : > { %1231 = vmatprep.subr.bf16.mxu1 %v1516_v1  ;;  %1303 = vmatprep.subr.bf16.mxu0 %v1516_v1  ;;  %v1244_v47 = vpack.c.bf16 %v323_v35, %v317_v32  ;;  %v1262_v32 = vpack.c.bf16 %v1829_v63, %v1827_v62  ;;  %v1265_v22 = vpack.c.bf16 %v1881_v19, %v1874_v15 }
  0x59   : > { %v363_v54 = vand.u32 4294901760, %v2006_v29  ;;  %v341_v58 = vand.u32 4294901760, %v340_v46  ;;  %v358_v2 = vsub.f32 %v1988_v17, %v357_v38  ;;  %v1325_v14 = vpack.c.bf16 %v357_v38, %v351_v28 }
  0x5a   : > { %v1271_v25 = vpack.c.bf16 %v1948_v45, %v1946_v44  ;;  %v1274_v31 = vpack.c.bf16 %v1972_v61, %v1970_v60 }
  0x5b   : > { %1233 = vmatpush3.bf16.msk.msra.mxu1 %vm1941_vm13, %v1519_v24  ;;  %1305 = vmatpush3.bf16.msk.msra.mxu0 %vm1941_vm13, %v1519_v24  ;;  %v359_v11 = vand.u32 4294901760, %v358_v2  ;;  %v364_v51 = vsub.f32 %v2006_v29, %v363_v54 }
  0x5c   : > { %1234 = vmatprep.subr.bf16.mxu1 %v1516_v1  ;;  %1306 = vmatprep.subr.bf16.mxu0 %v1516_v1 }
  0x5d   : > { %v365_v18 = vand.u32 4294901760, %v364_v51 }
  0x5e   : > { %1033 = vmatmul.mubr.f32.vlgmr.msra.gmra.mrb[0].mxu1 %v271_v48  ;;  %1138 = vmatmul.mubr.f32.vlgmr.msra.gmra.mrb[0].mxu0 %v269_v30  ;;  %v1313_v30 = vpack.c.bf16 %v309_v36, %v303_v33  ;;  %v2008_v33 = vsub.f32 %v200_v21, %v200_v21  ;;  %v1316_v36 = vpack.c.bf16 %v321_v43, %v315_v39  ;;  %v329_v48 = vand.u32 4294901760, %v328_v7 }
  0x5f   : > { %1236 = vmatpush3.bf16.msra.mxu1 %v1235_v50  ;;  %1308 = vmatpush3.bf16.msra.mxu0 %v1307_v52  ;;  %v335_v50 = vand.u32 4294901760, %v334_v37  ;;  %v346_v52 = vsub.f32 %v1972_v61, %v345_v10  ;;  %v352_v39 = vsub.f32 %v1986_v16, %v351_v28 }
  0x60   : > { %1237 = vmatprep.subr.bf16.mxu1 %v1516_v1  ;;  %1309 = vmatprep.subr.bf16.mxu0 %v1516_v1  ;;  %v369_v55 = vand.u32 4294901760, %v2008_v33  ;;  %v1280_v42 = vpack.c.bf16 %v2008_v33, %v2006_v29 }
  0x61   : > { %1067 = vmatprep.mubr.msk.f32.mxu1 %vm1517_vm0, %v1518_v4  ;;  %1172 = vmatprep.mubr.msk.f32.mxu0 %vm1517_vm0, %v1518_v4  ;;  %v1247_v43 = vpack.c.bf16 %v335_v50, %v329_v48  ;;  %v347_v0 = vand.u32 4294901760, %v346_v52  ;;  %v353_v5 = vand.u32 4294901760, %v352_v39 }
  0x62   : > { %v370_v59 = vsub.f32 %v2008_v33, %v369_v55 }
  0x63   : > { %1239 = vmatpush3.bf16.msra.mxu1 %v1238_v6  ;;  %1311 = vmatpush3.bf16.msra.mxu0 %v1310_v3  ;;  %v1322_v3 = vpack.c.bf16 %v345_v10, %v339_v9  ;;  %v1250_v6 = vpack.c.bf16 %v347_v0, %v341_v58  ;;  %v1253_v12 = vpack.c.bf16 %v359_v11, %v353_v5 }
  0x64   : > { %1240 = vmatprep.subr.bf16.mxu1 %v1516_v1  ;;  %1312 = vmatprep.subr.bf16.mxu0 %v1516_v1  ;;  %v371_v21 = vand.u32 4294901760, %v370_v59  ;;  %v1328_v10 = vpack.c.bf16 %v369_v55, %v363_v54 }
  0x66   : > { %v1256_v9 = vpack.c.bf16 %v371_v21, %v365_v18 }
  0x67   : > { %1242 = vmatpush3.bf16.msra.mxu1 %v1241_v34  ;;  %1314 = vmatpush3.bf16.msra.mxu0 %v1313_v30  ;;  %v1259_v30 = vpack.c.bf16 %v1786_v49, %v1762_v41  ;;  %v1277_v41 = vpack.c.bf16 %v1988_v17, %v1986_v16 }
  0x68   : > { %1243 = vmatprep.subr.bf16.mxu1 %v1516_v1  ;;  %1315 = vmatprep.subr.bf16.mxu0 %v1516_v1 }
  0x6b   : > { %1245 = vmatpush3.bf16.msra.mxu1 %v1244_v47  ;;  %1317 = vmatpush3.bf16.msra.mxu0 %v1316_v36 }
  0x6c   : > { %1246 = vmatprep.subr.bf16.mxu1 %v1516_v1  ;;  %1318 = vmatprep.subr.bf16.mxu0 %v1516_v1 }
  0x6f   : > { %1248 = vmatpush3.bf16.msra.mxu1 %v1247_v43  ;;  %1320 = vmatpush3.bf16.msra.mxu0 %v1319_v57 }
  0x70   : > { %1249 = vmatprep.subr.bf16.mxu1 %v1516_v1  ;;  %1321 = vmatprep.subr.bf16.mxu0 %v1516_v1 }
  0x73   : > { %1251 = vmatpush3.bf16.msra.mxu1 %v1250_v6  ;;  %1323 = vmatpush3.bf16.msra.mxu0 %v1322_v3 }
  0x74   : > { %1252 = vmatprep.subr.bf16.mxu1 %v1516_v1  ;;  %1324 = vmatprep.subr.bf16.mxu0 %v1516_v1 }
  0x77   : > { %1254 = vmatpush3.bf16.msra.mxu1 %v1253_v12  ;;  %1326 = vmatpush3.bf16.msra.mxu0 %v1325_v14 }
  0x78   : > { %1255 = vmatprep.subr.bf16.mxu1 %v1516_v1  ;;  %1327 = vmatprep.subr.bf16.mxu0 %v1516_v1 }
  0x7b   : > { %1257 = vmatpush3.bf16.msra.mxu1 %v1256_v9  ;;  %1329 = vmatpush3.bf16.msra.mxu0 %v1328_v10 }
  0x7c   : > { %1258 = vmatprep.subr.bf16.mxu1 %v1516_v1  ;;  %1330 = vmatprep.subr.bf16.mxu0 %v1516_v1 }
  0x7e   : > { %1068 = vmatmul.mubr.f32.vlgmr.msra.gmra.mrb[0].mxu1 %v1871_v13  ;;  %1173 = vmatmul.mubr.f32.vlgmr.msra.gmra.mrb[0].mxu0 %v1871_v13 }
  0x7f   : > { %1260 = vmatpush3.bf16.msra.mxu1 %v1259_v30  ;;  %1332 = vmatpush3.bf16.msk.msra.mxu0 %vm1685_vm4, %v1519_v24 }
  0x80   : > { %1261 = vmatprep.subr.bf16.mxu1 %v1516_v1  ;;  %1333 = vmatprep.subr.bf16.mxu0 %v1516_v1 }
  0x81   : > { %1102 = vmatprep.mubr.msk.f32.mxu1 %vm1517_vm0, %v1518_v4  ;;  %1207 = vmatprep.mubr.msk.f32.mxu0 %vm1517_vm0, %v1518_v4  ;;  %v1268_v4 = vpack.c.bf16 %v1904_v27, %v1892_v23 }
  0x83   : > { %1263 = vmatpush3.bf16.msra.mxu1 %v1262_v32  ;;  %1335 = vmatpush3.bf16.msk.msra.mxu0 %vm1706_vm6, %v1519_v24 }
  0x84   : > { %1264 = vmatprep.subr.bf16.mxu1 %v1516_v1  ;;  %1336 = vmatprep.subr.bf16.mxu0 %v1516_v1 }
  0x87   : > { %1266 = vmatpush3.bf16.msra.mxu1 %v1265_v22  ;;  %1338 = vmatpush3.bf16.msk.msra.mxu0 %vm1735_vm9, %v1519_v24 }
  0x88   : > { %1267 = vmatprep.subr.bf16.mxu1 %v1516_v1  ;;  %1339 = vmatprep.subr.bf16.mxu0 %v1516_v1 }
  0x8b   : > { %1269 = vmatpush3.bf16.msra.mxu1 %v1268_v4  ;;  %1341 = vmatpush3.bf16.msk.msra.mxu0 %vm1770_vm12, %v1519_v24 }
  0x8c   : > { %1270 = vmatprep.subr.bf16.mxu1 %v1516_v1  ;;  %1342 = vmatprep.subr.bf16.mxu0 %v1516_v1 }
  0x8f   : > { %1272 = vmatpush3.bf16.msra.mxu1 %v1271_v25  ;;  %1344 = vmatpush3.bf16.msk.msra.mxu0 %vm1807_vm15, %v1519_v24 }
  0x90   : > { %1273 = vmatprep.subr.bf16.mxu1 %v1516_v1  ;;  %1345 = vmatprep.subr.bf16.mxu0 %v1516_v1 }
  0x93   : > { %1275 = vmatpush3.bf16.msra.mxu1 %v1274_v31  ;;  %1347 = vmatpush3.bf16.msk.msra.mxu0 %vm1857_vm3, %v1519_v24 }
  0x94   : > { %1276 = vmatprep.subr.bf16.mxu1 %v1516_v1  ;;  %1348 = vmatprep.subr.bf16.mxu0 %v1516_v1 }
  0x97   : > { %1278 = vmatpush3.bf16.msra.mxu1 %v1277_v41  ;;  %1350 = vmatpush3.bf16.msk.msra.mxu0 %vm1900_vm8, %v1519_v24 }
  0x98   : > { %1279 = vmatprep.subr.bf16.mxu1 %v1516_v1  ;;  %1351 = vmatprep.subr.bf16.mxu0 %v1516_v1 }
  0x9b   : > { %1281 = vmatpush3.bf16.msra.mxu1 %v1280_v42  ;;  %1353 = vmatpush3.bf16.msk.msra.mxu0 %vm1941_vm13, %v1519_v24 }
  0x9e   : > { %1103 = vmatmul.mubr.f32.vlgmr.msra.gmra.mrb[0].mxu1 %v1890_v20  ;;  %1208 = vmatmul.mubr.f32.vlgmr.msra.gmra.mrb[0].mxu0 %v1871_v13 }
 0x171   : > { %v496_v49 = vpop.f32.mrb[0].mxu1  ;;  %v743_v53 = vpop.f32.mrb[0].mxu0 }
 0x172   : > { %v1354_v62 = vadd.f32 %v743_v53, %v496_v49  ;;  %v1104_v63 = vpop.f32.mrb[1].mxu1  ;;  %v1209_v8 = vpop.f32.mrb[1].mxu0 }
 0x174   : > { %v747_v15 = vmax.f32 %v1354_v62, 1e-30 }
 0x176   : > { %1413 = vrsqrt.f32 %v747_v15 }
 0x180   : > { %v1414_v1 = vpop.eup %1413 }
 0x181   : > { %v749_v19 = vmul.f32 %v1414_v1, %v747_v15 }
 0x183   : > { %1415 = vtanh.f32 %v749_v19 }
 0x18d   : > { %v1416_v23 = vpop.eup %1415 }
 0x18e   : > { %v751_v24 = vmul.f32 %v1416_v23, %v1414_v1 }
 0x190   : > { %v752_v13 = vmul.f32 %v751_v24, %v1813_v56 }
 0x192   : > { %753 = vst [vmem:[%s131_s25] sm:$0xff] %v752_v13 }
 0x193   : > { %1460 = shalt.err (!%p1457_p4)
}
 0x194   : > { %s1461_s5 = scalar_lea.hbm %s2099_s29, 128  ;;  %s1465_s14 = scalar_lea.hbm %s2144_s1, 256 }
 0x195   : > { %p1462_p5 = scmp.ne.s32.totalorder %s2099_s29, %s1461_s5  ;;  %p1466_p0 = scmp.lt.u32.totalorder %s2099_s29, %s2144_s1 }
 0x196   : > { %p1467_p1 = scmp.lt.u32.totalorder %s1465_s14, %s1461_s5  ;;  %p1469_p6 = scmp.lt.u32.totalorder %s1461_s5, %s2099_s29 }
 0x197   : > { %p1463_p8 = pnand %p1462_p5, %p2201_p11 }
 0x198   : > { %p1468_p3 = por %p1467_p1, %p1466_p0 }
 0x199   : > { %p1464_p9 = pneg %p1463_p8 }
 0x19a   : > { %p1470_p12 = por %p1469_p6, %p1468_p3 }
 0x19c   : > { %p1471_p13 = pnand %p1470_p12, %p1464_p9 }
 0x19e   : > { %1474 = shalt.err (!%p1471_p13)
}
 0x19f   : > { %1365 = dma.vmem_to_hbm [thread:$0]  (%p2201_p11), %s2101_s26, 128, %s2099_s29, %s755_s30  }
 0x1a0 PF: > { %s780_s21 = sand.u32 1, %s1501_s6   ;;  %p2202_p7 = scmp.ne.s32.totalorder %s2149_s19, 0 }
 0x1a1   : > { %p2203_p10 = scmp.ge.s32.totalorder %s1513_s9, 2  ;;  %s781_s22 = scalar_lea.sflag [#allocation4], %s780_s21 }
 0x1a3   : > { %p1372_p2 = pnand %p2203_p10, %p2202_p7 }
 0x1a5   : > { %1496 = dma.done.wait (!%p1372_p2), %s781_s22, 128  }
 0x1a6   : > { %1498 = vsyncadd (!%p1372_p2), %s781_s22, 4294967168  ;;  %p14_p4 = scmp.ge.s32.totalorder %s1556_s12, 4   ;;  %s2204_s6 = smov %s1505_s7 }
 0x1a7   : > { %s2205_s7 = smov %s1509_s8  ;;  %s2206_s8 = smov %s1568_s15 }
 0x1a8   : > { %s2207_s9 = smov %s1556_s12  ;;  %16 = sbr.rel (!%p14_p4) target bundleno = 5 (0x5), region = 69 }
 0x1af   :  { %786 = vsyncpa [#allocation3], 1 }
 0x1b0   :  { %788 = vsyncpa [#allocation3 + $0x1], 1 }
 0x1b1   :  { %789 = vsyncpa [#allocation4], 1 }
 0x1b2   :  { %791 = vsyncpa [#allocation4 + $0x1], 1 }

</bundles_post_ra>
